<compile_context>
chip_gen: v7x
topology: tpu7x:2x2x1
jax: 0.10.0
libtpu: 0.0.40
codegen_flags: <defaults>
</compile_context>

<pallas_src>
import functools

import jax
import jax.numpy as jnp
from jax.experimental import pallas as pl
from jax.experimental.pallas import tpu as pltpu


def _round_up(n, m):
    return ((n + m - 1) // m) * m


def _cdiv(a, b):
    return -(-a // b)


# ----------------------------------------------------------------------------
# Kernel
# ----------------------------------------------------------------------------
def _cell_counter_kernel(x_ref, pa_act_ref, w_enc_ref, w_pred_ref, bias_ref,
                         out_ref, *, off_act, num_actions, val_lane):
    tb = x_ref.shape[0]
    lane_w = w_enc_ref.shape[1]

    bias = bias_ref[...]                                    # [2, lane_w] f32
    b_enc = bias[0:1, :]
    b_pred = bias[1:2, :]

    # --- fused cell encoders (rew lanes [0,H), critic lanes [H,2H)): one MXU pass
    x = x_ref[...].astype(jnp.bfloat16)                     # cast in-kernel (single HBM read)
    h = jnp.dot(x, w_enc_ref[...], preferred_element_type=jnp.float32)
    h = h + b_enc
    h = jnp.where(h > 0, h, 0.01 * h)                       # LeakyReLU (pad lanes stay 0)

    # --- prev-action one-hot dropped straight into lanes [2H, 2H+A) (VPU only)
    pa_act = pa_act_ref[...]                                # [TB, 2] i32
    pa = pa_act[:, 0:1]
    act = pa_act[:, 1:2]
    lane = jax.lax.broadcasted_iota(jnp.int32, (tb, lane_w), 1)
    # prev_actions == -1 ("done") -> all-zero one-hot
    h = h + jnp.where((lane == pa + off_act) & (pa >= 0), 1.0, 0.0)

    # --- int_rew_predictor + critic head fused in one [lane_w, lane_w] matmul:
    #     columns [0, A) = Linear(concat[h_rew, pa_onehot]); column val_lane =
    #     int_critic_linear(h_crit).  Critic lanes hit zero rows for pred cols.
    z = jnp.dot(h.astype(jnp.bfloat16), w_pred_ref[...],
                preferred_element_type=jnp.float32)
    z = z + b_pred                                          # includes b_val at val_lane

    # --- gather logit at the (done-clamped) action, tanh on the gathered lane
    act = jnp.clip(act, 0, num_actions - 1)                 # actions[actions == -1] = 0
    rew = jnp.tanh(jnp.sum(jnp.where(lane == act, z, 0.0), axis=-1, keepdims=True))
    # --- critic value = column val_lane (no activation)
    val = jnp.sum(jnp.where(lane == val_lane, z, 0.0), axis=-1, keepdims=True)

    # --- narrow packed output: col 0 = int reward, col 1 = int value
    lane8 = jax.lax.broadcasted_iota(jnp.int32, (tb, out_ref.shape[1]), 1)
    out_ref[...] = jnp.where(lane8 == 0, rew, jnp.where(lane8 == 1, val, 0.0))


# ----------------------------------------------------------------------------
# Parameters
# ----------------------------------------------------------------------------
def init_raw_params(key, cell_dim, h_sp, w_sp, hidden, num_actions):
    """Deterministic synthetic parameters matching the PyTorch module's shapes."""
    ks = jax.random.split(key, 8)
    s = 0.1
    return {
        # Conv2d(cell_dim, hidden, kernel=(H,W))
        "conv_rew_w":  s * jax.random.normal(ks[0], (hidden, cell_dim, h_sp, w_sp), jnp.float32),
        "conv_rew_b":  s * jax.random.normal(ks[1], (hidden,), jnp.float32),
        "conv_crit_w": s * jax.random.normal(ks[2], (hidden, cell_dim, h_sp, w_sp), jnp.float32),
        "conv_crit_b": s * jax.random.normal(ks[3], (hidden,), jnp.float32),
        # Linear(hidden + num_actions -> num_actions)
        "pred_w": s * jax.random.normal(ks[4], (num_actions, hidden + num_actions), jnp.float32),
        "pred_b": s * jax.random.normal(ks[5], (num_actions,), jnp.float32),
        # Linear(hidden -> 1)
        "val_w": s * jax.random.normal(ks[6], (1, hidden), jnp.float32),
        "val_b": s * jax.random.normal(ks[7], (1,), jnp.float32),
    }


def pack_params(raw, cell_dim, h_sp, w_sp, hidden, num_actions,
                matmul_dtype=jnp.bfloat16):
    """Fuse / pad the PyTorch-shaped params into the lane-dense kernel layout."""
    d = cell_dim * h_sp * w_sp
    lane_w = max(128, _round_up(2 * hidden + num_actions, 128))
    off_crit = hidden
    off_act = 2 * hidden
    val_lane = num_actions                       # critic-head output column
    assert off_act + num_actions <= lane_w and val_lane + 1 <= lane_w

    w_rew = raw["conv_rew_w"].reshape(hidden, d).T          # [D, H]
    w_crit = raw["conv_crit_w"].reshape(hidden, d).T        # [D, H]

    w_enc = jnp.zeros((d, lane_w), jnp.float32)
    w_enc = w_enc.at[:, :hidden].set(w_rew)
    w_enc = w_enc.at[:, off_crit:off_crit + hidden].set(w_crit)

    b_enc = jnp.zeros((lane_w,), jnp.float32)
    b_enc = b_enc.at[:hidden].set(raw["conv_rew_b"])
    b_enc = b_enc.at[off_crit:off_crit + hidden].set(raw["conv_crit_b"])

    w_pred = jnp.zeros((lane_w, lane_w), jnp.float32)
    w_pred = w_pred.at[:hidden, :num_actions].set(raw["pred_w"][:, :hidden].T)
    w_pred = w_pred.at[off_act:off_act + num_actions, :num_actions].set(
        raw["pred_w"][:, hidden:].T)
    # critic head folded in as one extra output column
    w_pred = w_pred.at[off_crit:off_crit + hidden, val_lane].set(raw["val_w"][0])

    b_pred = jnp.zeros((lane_w,), jnp.float32)
    b_pred = b_pred.at[:num_actions].set(raw["pred_b"])
    b_pred = b_pred.at[val_lane].set(raw["val_b"][0])

    bias = jnp.stack([b_enc, b_pred], axis=0)               # [2, lane_w] f32

    packed = dict(w_enc=w_enc.astype(matmul_dtype),
                  w_pred=w_pred.astype(matmul_dtype),
                  bias=bias)
    meta = dict(off_act=off_act, num_actions=num_actions,
                lane_w=lane_w, val_lane=val_lane)
    return packed, meta


def _cost_estimate(rows, d, lane_w, x_bytes, w_bytes):
    flops = 2 * rows * d * lane_w + 2 * rows * lane_w * lane_w + 10 * rows * lane_w
    transcendentals = rows                                   # tanh on the gathered lane
    weight_bytes = w_bytes * (d * lane_w + lane_w * lane_w) + 4 * 2 * lane_w
    bytes_accessed = rows * (d * x_bytes + 2 * 4 + 8 * 4) + weight_bytes
    return pl.CostEstimate(flops=flops, transcendentals=transcendentals,
                           bytes_accessed=bytes_accessed)


# ----------------------------------------------------------------------------
# Tiling: minimal padding waste, even tile count (>1) for v7x dual-TC
# ----------------------------------------------------------------------------
def _choose_tiling(b, tb_max):
    b8 = _round_up(max(b, 8), 8)
    n_tiles = _cdiv(b8, tb_max)
    if n_tiles > 1 and n_tiles % 2 == 1:
        n_tiles += 1                       # even split across the 2 v7x TensorCores
    tb = _round_up(_cdiv(b, n_tiles), 8)   # waste per kernel launch is only a few rows
    return n_tiles, tb


# ----------------------------------------------------------------------------
# Wrapper (== CellCounterWrapper.forward learnable-cell branch)
# ----------------------------------------------------------------------------
def cell_counter_forward(reps, prev_actions, actions, packed, meta, *, tb_max=1024):
    """Returns (int_rewards [B], int_values [B, 1])."""
    b, c, hh, ww = reps.shape
    d = c * hh * ww
    lane_w = meta["lane_w"]
    n_tiles, tb = _choose_tiling(b, tb_max)

    # No jnp.pad: Pallas masks the ragged last tile (garbage rows only reach
    # masked-out output rows).  x keeps its dtype; bf16 cast happens in-kernel.
    x = reps.reshape(b, d)
    pa_act = jnp.stack([prev_actions.astype(jnp.int32),
                        actions.astype(jnp.int32)], axis=1)            # [B, 2]

    kernel = functools.partial(_cell_counter_kernel,
                               off_act=meta["off_act"],
                               num_actions=meta["num_actions"],
                               val_lane=meta["val_lane"])

    def resident(shape):
        return pl.BlockSpec(shape, lambda i: (0, 0))    # weights stay VMEM-resident

    out = pl.pallas_call(
        kernel,
        out_shape=jax.ShapeDtypeStruct((b, 8), jnp.float32),
        grid=(n_tiles,),
        in_specs=[
            pl.BlockSpec((tb, d), lambda i: (i, 0)),    # reps tiles (pipelined)
            pl.BlockSpec((tb, 2), lambda i: (i, 0)),    # [prev_action, action]
            resident(packed["w_enc"].shape),
            resident(packed["w_pred"].shape),
            resident(packed["bias"].shape),
        ],
        out_specs=pl.BlockSpec((tb, 8), lambda i: (i, 0)),
        compiler_params=pltpu.CompilerParams(
            dimension_semantics=("parallel",)),         # v7x: shard batch over 2 TCs
        cost_estimate=_cost_estimate(n_tiles * tb, d, lane_w,
                                     x_bytes=jnp.dtype(x.dtype).itemsize,
                                     w_bytes=jnp.dtype(packed["w_enc"].dtype).itemsize),
    )(x, pa_act, packed["w_enc"], packed["w_pred"], packed["bias"])

    int_rewards = out[:, 0]          # gathered int_rew_predictor output, squeezed
    int_values = out[:, 1:2]         # int_critic_linear output, [B, 1]
    return int_rewards, int_values


# ----------------------------------------------------------------------------
# Pure-JAX reference (mirrors the PyTorch forward, built from the RAW params;
# matmuls use the same bf16-operand / f32-accumulate precision as the kernel)
# ----------------------------------------------------------------------------
def _reference(reps, prev_actions, actions, raw, hidden, num_actions,
               matmul_dtype=jnp.bfloat16):
    b = reps.shape[0]
    x = reps.reshape(b, -1).astype(jnp.float32)
    lrelu = lambda v: jnp.where(v > 0, v, 0.01 * v)
    mm = lambda a, w: jnp.dot(a.astype(matmul_dtype), w.astype(matmul_dtype),
                              preferred_element_type=jnp.float32)

    h_rew = lrelu(mm(x, raw["conv_rew_w"].reshape(hidden, -1).T) + raw["conv_rew_b"])
    pa = prev_actions.astype(jnp.int32)
    lanes = jnp.arange(num_actions)[None, :]
    pa_oh = jnp.where((pa[:, None] == lanes) & (pa[:, None] >= 0), 1.0, 0.0)
    ext = jnp.concatenate([h_rew, pa_oh], axis=-1)
    logits = jnp.tanh(mm(ext, raw["pred_w"].T) + raw["pred_b"])
    act = jnp.where(actions >= 0, actions, 0).astype(jnp.int32)
    int_rew = jnp.take_along_axis(logits, act[:, None], axis=1)[:, 0]

    h_crit = lrelu(mm(x, raw["conv_crit_w"].reshape(hidden, -1).T) + raw["conv_crit_b"])
    int_val = mm(h_crit, raw["val_w"].T) + raw["val_b"]
    return int_rew, int_val


# ----------------------------------------------------------------------------
if __name__ == "__main__":
    cell_dim, hsp, wsp = 4, 5, 5
    hidden, num_actions = 32, 8

    key = jax.random.PRNGKey(0)
    k_param, k_data = jax.random.split(key)

    raw = init_raw_params(k_param, cell_dim, hsp, wsp, hidden, num_actions)
    packed, meta = pack_params(raw, cell_dim, hsp, wsp, hidden, num_actions)

    # (B, tb_max): sub-8 batch, exact tile, ragged single tile, ragged multi-tile grid.
    cases = [(2, 1024), (8, 1024), (300, 1024), (300, 128)]
    for b, tb_max in cases:
        kd = jax.random.fold_in(k_data, 10 * b + tb_max)
        kr, kp, ka = jax.random.split(kd, 3)
        reps = jax.random.normal(kr, (b, cell_dim, hsp, wsp), jnp.float32)
        # actions / prev_actions in [-1, A-1]; -1 marks episode boundaries ("done")
        prev_actions = jax.random.randint(kp, (b,), -1, num_actions, jnp.int32)
        actions = jax.random.randint(ka, (b,), -1, num_actions, jnp.int32)

        int_rew, int_val = cell_counter_forward(reps, prev_actions, actions,
                                                packed, meta, tb_max=tb_max)
        jax.block_until_ready((int_rew, int_val))

        ref_rew, ref_val = _reference(reps, prev_actions, actions, raw,
                                      hidden, num_actions)
        assert int_rew.shape == (b,) and int_val.shape == (b, 1)
        assert jnp.allclose(int_rew, ref_rew, atol=2e-3, rtol=2e-3), \
            f"reward mismatch at B={b}, tb_max={tb_max}"
        assert jnp.allclose(int_val, ref_val, atol=2e-3, rtol=2e-3), \
            f"value mismatch at B={b}, tb_max={tb_max}"

    print("KERNEL_OK")
</pallas_src>

<mosaic_0001>
module attributes {stable_mosaic.version = 11 : i64} {
  func.func @_cell_counter_kernel(%arg0: i32, %arg1: memref<8x100xf32, #tpu.memory_space<vmem>>, %arg2: memref<8x2xi32, #tpu.memory_space<vmem>>, %arg3: memref<100x128xbf16, #tpu.memory_space<vmem>>, %arg4: memref<128x128xbf16, #tpu.memory_space<vmem>>, %arg5: memref<2x128xf32, #tpu.memory_space<vmem>>, %arg6: memref<8x8xf32, #tpu.memory_space<vmem>>) attributes {dimension_semantics = [#tpu.dimension_semantics<parallel>], iteration_bounds = array<i64: 1>, scalar_prefetch = 0 : i64, scratch_operands = 0 : i64, tpu.core_type = #tpu.core_type<tc>, window_params = [{transform_indices = @transform_0, window_bounds = array<i64: 8, 100>}, {transform_indices = @transform_1, window_bounds = array<i64: 8, 2>}, {pipeline_mode = #tpu.pipeline_mode<synchronous>, transform_indices = @transform_2, window_bounds = array<i64: 100, 128>}, {pipeline_mode = #tpu.pipeline_mode<synchronous>, transform_indices = @transform_3, window_bounds = array<i64: 128, 128>}, {pipeline_mode = #tpu.pipeline_mode<synchronous>, transform_indices = @transform_4, window_bounds = array<i64: 2, 128>}, {transform_indices = @transform_5, window_bounds = array<i64: 8, 8>}]} {
    %c0 = arith.constant 0 : index
    %c0_0 = arith.constant 0 : index
    %0 = vector.load %arg5[%c0, %c0_0] : memref<2x128xf32, #tpu.memory_space<vmem>>, vector<2x128xf32>
    %1 = vector.extract_strided_slice %0 {offsets = [0, 0], sizes = [1, 128], strides = [1, 1]} : vector<2x128xf32> to vector<1x128xf32>
    %2 = vector.extract_strided_slice %0 {offsets = [1, 0], sizes = [1, 128], strides = [1, 1]} : vector<2x128xf32> to vector<1x128xf32>
    %c0_1 = arith.constant 0 : index
    %c0_2 = arith.constant 0 : index
    %3 = vector.load %arg1[%c0_1, %c0_2] : memref<8x100xf32, #tpu.memory_space<vmem>>, vector<8x100xf32>
    %4 = arith.truncf %3 : vector<8x100xf32> to vector<8x100xbf16>
    %c0_3 = arith.constant 0 : index
    %c0_4 = arith.constant 0 : index
    %5 = vector.load %arg3[%c0_3, %c0_4] : memref<100x128xbf16, #tpu.memory_space<vmem>>, vector<100x128xbf16>
    %cst = arith.constant dense<0.000000e+00> : vector<8x128xf32>
    %6 = tpu.matmul %4, %5, %cst {dimension_numbers = #tpu.dot_dimension_numbers<[1], [0], [0], [1], [0, 0, 1, 1], [], []>} : vector<8x100xbf16>, vector<100x128xbf16>, vector<8x128xf32> -> vector<8x128xf32>
    %7 = vector.broadcast %1 : vector<1x128xf32> to vector<8x128xf32>
    %8 = arith.addf %6, %7 : vector<8x128xf32>
    %cst_5 = arith.constant 0.000000e+00 : f32
    %9 = vector.broadcast %cst_5 : f32 to vector<8x128xf32>
    %10 = arith.cmpf ogt, %8, %9 : vector<8x128xf32>
    %cst_6 = arith.constant 0.00999999977 : f32
    %11 = vector.broadcast %cst_6 : f32 to vector<8x128xf32>
    %12 = arith.mulf %11, %8 : vector<8x128xf32>
    %13 = arith.select %10, %8, %12 : vector<8x128xi1>, vector<8x128xf32>
    %c0_7 = arith.constant 0 : index
    %c0_8 = arith.constant 0 : index
    %14 = vector.load %arg2[%c0_7, %c0_8] : memref<8x2xi32, #tpu.memory_space<vmem>>, vector<8x2xi32>
    %15 = vector.extract_strided_slice %14 {offsets = [0, 0], sizes = [8, 1], strides = [1, 1]} : vector<8x2xi32> to vector<8x1xi32>
    %16 = vector.extract_strided_slice %14 {offsets = [0, 1], sizes = [8, 1], strides = [1, 1]} : vector<8x2xi32> to vector<8x1xi32>
    %17 = tpu.iota {dimensions = array<i32: 1>} : vector<8x128xi32>
    %c64_i32 = arith.constant 64 : i32
    %18 = vector.broadcast %c64_i32 : i32 to vector<8x1xi32>
    %19 = arith.addi %15, %18 : vector<8x1xi32>
    %20 = vector.broadcast %19 : vector<8x1xi32> to vector<8x128xi32>
    %21 = arith.cmpi eq, %17, %20 : vector<8x128xi32>
    %c0_i32 = arith.constant 0 : i32
    %22 = vector.broadcast %c0_i32 : i32 to vector<8x1xi32>
    %23 = arith.cmpi sge, %15, %22 : vector<8x1xi32>
    %24 = vector.broadcast %23 : vector<8x1xi1> to vector<8x128xi1>
    %25 = arith.andi %21, %24 : vector<8x128xi1>
    %cst_9 = arith.constant 1.000000e+00 : f32
    %cst_10 = arith.constant 0.000000e+00 : f32
    %26 = vector.broadcast %cst_9 : f32 to vector<8x128xf32>
    %27 = vector.broadcast %cst_10 : f32 to vector<8x128xf32>
    %28 = arith.select %25, %26, %27 : vector<8x128xi1>, vector<8x128xf32>
    %29 = arith.addf %13, %28 : vector<8x128xf32>
    %30 = arith.truncf %29 : vector<8x128xf32> to vector<8x128xbf16>
    %c0_11 = arith.constant 0 : index
    %c0_12 = arith.constant 0 : index
    %31 = vector.load %arg4[%c0_11, %c0_12] : memref<128x128xbf16, #tpu.memory_space<vmem>>, vector<128x128xbf16>
    %cst_13 = arith.constant dense<0.000000e+00> : vector<8x128xf32>
    %32 = tpu.matmul %30, %31, %cst_13 {dimension_numbers = #tpu.dot_dimension_numbers<[1], [0], [0], [1], [0, 0, 1, 1], [], []>} : vector<8x128xbf16>, vector<128x128xbf16>, vector<8x128xf32> -> vector<8x128xf32>
    %33 = vector.broadcast %2 : vector<1x128xf32> to vector<8x128xf32>
    %34 = arith.addf %32, %33 : vector<8x128xf32>
    %c0_i32_14 = arith.constant 0 : i32
    %c7_i32 = arith.constant 7 : i32
    %35 = vector.broadcast %c0_i32_14 : i32 to vector<8x1xi32>
    %36 = arith.maxsi %35, %16 : vector<8x1xi32>
    %37 = vector.broadcast %c7_i32 : i32 to vector<8x1xi32>
    %38 = arith.minsi %37, %36 : vector<8x1xi32>
    %39 = vector.broadcast %38 : vector<8x1xi32> to vector<8x128xi32>
    %40 = arith.cmpi eq, %17, %39 : vector<8x128xi32>
    %cst_15 = arith.constant 0.000000e+00 : f32
    %41 = vector.broadcast %cst_15 : f32 to vector<8x128xf32>
    %42 = arith.select %40, %34, %41 : vector<8x128xi1>, vector<8x128xf32>
    %cst_16 = arith.constant dense<0.000000e+00> : vector<8xf32>
    %43 = vector.multi_reduction <add>, %42, %cst_16 [1] : vector<8x128xf32> to vector<8xf32>
    %44 = vector.shape_cast %43 : vector<8xf32> to vector<8x1xf32>
    %45 = math.tanh %44 : vector<8x1xf32>
    %c8_i32 = arith.constant 8 : i32
    %46 = vector.broadcast %c8_i32 : i32 to vector<8x128xi32>
    %47 = arith.cmpi eq, %17, %46 : vector<8x128xi32>
    %cst_17 = arith.constant 0.000000e+00 : f32
    %48 = vector.broadcast %cst_17 : f32 to vector<8x128xf32>
    %49 = arith.select %47, %34, %48 : vector<8x128xi1>, vector<8x128xf32>
    %cst_18 = arith.constant dense<0.000000e+00> : vector<8xf32>
    %50 = vector.multi_reduction <add>, %49, %cst_18 [1] : vector<8x128xf32> to vector<8xf32>
    %51 = vector.shape_cast %50 : vector<8xf32> to vector<8x1xf32>
    %52 = tpu.iota {dimensions = array<i32: 1>} : vector<8x8xi32>
    %c0_i32_19 = arith.constant 0 : i32
    %53 = vector.broadcast %c0_i32_19 : i32 to vector<8x8xi32>
    %54 = arith.cmpi eq, %52, %53 : vector<8x8xi32>
    %c1_i32 = arith.constant 1 : i32
    %55 = vector.broadcast %c1_i32 : i32 to vector<8x8xi32>
    %56 = arith.cmpi eq, %52, %55 : vector<8x8xi32>
    %cst_20 = arith.constant 0.000000e+00 : f32
    %57 = vector.shape_cast %51 : vector<8x1xf32> to vector<8x1xf32>
    %58 = vector.broadcast %57 : vector<8x1xf32> to vector<8x8xf32>
    %59 = vector.broadcast %cst_20 : f32 to vector<8x8xf32>
    %60 = arith.select %56, %58, %59 : vector<8x8xi1>, vector<8x8xf32>
    %61 = vector.shape_cast %45 : vector<8x1xf32> to vector<8x1xf32>
    %62 = vector.broadcast %61 : vector<8x1xf32> to vector<8x8xf32>
    %63 = arith.select %54, %62, %60 : vector<8x8xi1>, vector<8x8xf32>
    %c0_21 = arith.constant 0 : index
    %c0_22 = arith.constant 0 : index
    %64 = vector.load %arg6[%c0_21, %c0_22] : memref<8x8xf32, #tpu.memory_space<vmem>>, vector<8x8xf32>
    tpu.vector_store %arg6[%c0_21, %c0_22], %63 {strides = array<i32>} : memref<8x8xf32, #tpu.memory_space<vmem>>, vector<8x8xf32>,
    return
  }
  func.func @transform_0(%arg0: i32) -> (i32, i32) {
    %c0_i32 = arith.constant 0 : i32
    %c0_i32_0 = arith.constant 0 : i32
    return %arg0, %c0_i32 : i32, i32
  }
  func.func @transform_1(%arg0: i32) -> (i32, i32) {
    %c0_i32 = arith.constant 0 : i32
    %c0_i32_0 = arith.constant 0 : i32
    return %arg0, %c0_i32 : i32, i32
  }
  func.func @transform_2(%arg0: i32) -> (i32, i32) {
    %c0_i32 = arith.constant 0 : i32
    %c0_i32_0 = arith.constant 0 : i32
    %c0_i32_1 = arith.constant 0 : i32
    return %c0_i32, %c0_i32_0 : i32, i32
  }
  func.func @transform_3(%arg0: i32) -> (i32, i32) {
    %c0_i32 = arith.constant 0 : i32
    %c0_i32_0 = arith.constant 0 : i32
    %c0_i32_1 = arith.constant 0 : i32
    return %c0_i32, %c0_i32_0 : i32, i32
  }
  func.func @transform_4(%arg0: i32) -> (i32, i32) {
    %c0_i32 = arith.constant 0 : i32
    %c0_i32_0 = arith.constant 0 : i32
    %c0_i32_1 = arith.constant 0 : i32
    return %c0_i32, %c0_i32_0 : i32, i32
  }
  func.func @transform_5(%arg0: i32) -> (i32, i32) {
    %c0_i32 = arith.constant 0 : i32
    %c0_i32_0 = arith.constant 0 : i32
    return %arg0, %c0_i32 : i32, i32
  }
}

</mosaic_0001>

<bundles_post_ra>
// kernel: tpu_custom_call.1
= control target key start
LH: loop header
LB: loop body
LE: loop exit
PB: predicated region body
PF: predicated region fallthrough
CT: control target
= control target key end

     0   :  { %10 = vsyncpa [#allocation3], 0  ;;  %s662_s0 = inlined_call_operand.hbm [shape: f32[2,100], index: 0, kind: input, shape index: {}]   ;;  %s663_s1 = inlined_call_operand.vmem [shape: s32[2,2], index: 1, kind: input, shape index: {}]   ;;  %s664_s2 = inlined_call_operand.hbm [shape: bf16[100,128], index: 2, kind: input, shape index: {}]   ;;  %s665_s3 = inlined_call_operand.hbm [shape: bf16[128,128], index: 3, kind: input, shape index: {}]   ;;  %s666_s4 = inlined_call_operand.vmem [shape: f32[2,128], index: 4, kind: input, shape index: {}]   ;;  %s667_s5 = inlined_call_operand.hbm [shape: f32[2,8], index: 5, kind: output, shape index: {}]  }
   0x1   :  { %11 = vsyncpa [#allocation6], 0 }
   0x2   :  { %12 = vsyncpa [#allocation4], 0 }
   0x3   :  { %17 = vsyncadd [#allocation3], 96  ;;  %s536_s18 = smov [#allocation5]   ;;  %s442_s22 = scalar_lea.hbm %s664_s2, 832 }
   0x4   :  { %s32_s19 = sshll.u32 %s536_s18, 4  ;;  %p443_p0 = scmp.ne.s32.totalorder %s664_s2, %s442_s22  ;;  %s33_s19 = int_to_ptr.vmem [resolvable:$true] %s32_s19 }
   0x5   :  { %p446_p1 = scmp.lt.u32.totalorder %s442_s22, %s664_s2 }
   0x7   :  { %p448_p2 = pnand %p446_p1, %p443_p0 }
   0x9   :  { %451 = shalt.err (!%p448_p2)
}
   0xa   :  { %s452_s27 = scalar_lea.vmem %s33_s19, 832  ;;  %p457_p4 = scmp.lt.s32.totalorder %s33_s19, %s33_s19 }
   0xb   :  { %p453_p3 = scmp.ne.s32.totalorder %s33_s19, %s452_s27  ;;  %p458_p5 = scmp.lt.s32.totalorder %s452_s27, %s452_s27 }
   0xd   :  { %p459_p6 = por %p458_p5, %p457_p4 }
   0xf   :  { %p460_p7 = pnand %p459_p6, %p453_p3 }
  0x11   :  { %463 = shalt.err (!%p460_p7)
}
  0x12   :  { %s537_s28 = smov 64   ;;  %s538_s29 = smov 4  }
  0x13   :  { %38 = dma.hbm_to_vmem [thread:$0]  %s664_s2, 832, %s33_s19, [#allocation6], %s537_s28, %s537_s28, %s538_s29  }
  0x14   :  { %s539_s7 = smov [#allocation2]   ;;  %s464_s11 = scalar_lea.hbm %s662_s0, 32 }
  0x15   :  { %s18_s8 = sshll.u32 %s539_s7, 4  ;;  %p465_p8 = scmp.ne.s32.totalorder %s662_s0, %s464_s11  ;;  %s19_s8 = int_to_ptr.vmem [resolvable:$true] %s18_s8 }
  0x16   :  { %p468_p9 = scmp.lt.u32.totalorder %s464_s11, %s662_s0 }
  0x18   :  { %p470_p10 = pnand %p468_p9, %p465_p8 }
  0x1a   :  { %473 = shalt.err (!%p470_p10)
}
  0x1b   :  { %s474_s16 = scalar_lea.vmem %s19_s8, 32  ;;  %s478_s2 = scalar_lea.vmem %s19_s8, 128 }
  0x1c   :  { %p475_p11 = scmp.ne.s32.totalorder %s19_s8, %s474_s16  ;;  %p479_p12 = scmp.lt.s32.totalorder %s19_s8, %s19_s8 }
  0x1d   :  { %p480_p13 = scmp.lt.s32.totalorder %s478_s2, %s474_s16 }
  0x1f   :  { %p481_p0 = por %p480_p13, %p479_p12 }
  0x21   :  { %p482_p1 = pnand %p481_p0, %p475_p11 }
  0x23   :  { %485 = shalt.err (!%p482_p1)
}
  0x24   :  { %s540_s17 = smov 32   ;;  %s541_s18 = smov 2  }
  0x25   :  { %24 = dma.hbm_to_vmem [thread:$0]  %s662_s0, 32, %s19_s8, [#allocation3], %s540_s17, %s540_s17, %s541_s18  }
  0x26   :  { %s542_s21 = smov [#allocation7]   ;;  %s486_s25 = scalar_lea.hbm %s665_s3, 1024 }
  0x27   :  { %s44_s22 = sshll.u32 %s542_s21, 4  ;;  %p487_p2 = scmp.ne.s32.totalorder %s665_s3, %s486_s25  ;;  %s45_s22 = int_to_ptr.vmem [resolvable:$true] %s44_s22 }
  0x28   :  { %p490_p3 = scmp.lt.u32.totalorder %s486_s25, %s665_s3 }
  0x2a   :  { %p492_p4 = pnand %p490_p3, %p487_p2 }
  0x2c   :  { %495 = shalt.err (!%p492_p4)
}
  0x2d   :  { %s496_s7 = scalar_lea.vmem %s45_s22, 1024  ;;  %p501_p6 = scmp.lt.s32.totalorder %s45_s22, %s45_s22 }
  0x2e   :  { %p497_p5 = scmp.ne.s32.totalorder %s45_s22, %s496_s7  ;;  %p502_p7 = scmp.lt.s32.totalorder %s496_s7, %s496_s7 }
  0x30   :  { %p503_p8 = por %p502_p7, %p501_p6 }
  0x32   :  { %p504_p9 = pnand %p503_p8, %p497_p5 }
  0x34   :  { %507 = shalt.err (!%p504_p9)
}
  0x35   :  { %50 = dma.hbm_to_vmem [thread:$0]  %s665_s3, 1024, %s45_s22, [#allocation6], %s537_s28, %s537_s28, %s538_s29  }
  0x36   :  { %530 = dma.done.wait [#allocation3], 128  }
  0x37   :  { %531 = vsyncadd [#allocation3], 4294967168 }
  0x38   :  { %532 = dma.done.wait [#allocation6], 1856  }
  0x39   :  { %533 = vsyncadd [#allocation6], 4294965440  ;;  %v543_v0 = vmov 0.0   ;;  %vm544_vm0 = vmmov 0   ;;  %v545_v1 = vmov 0   ;;  %v425_v2 = vld [vmem:[#allocation5] sm:$0xff]   ;;  %v79_v26 = vlaneseq }
  0x3a   :  { %372 = vmatprep.subr.bf16.mxu0 %v543_v0  ;;  %386 = vmatprep.mubr.msk.bf16.mxu0 %vm544_vm0, %v543_v0  ;;  %v426_v3 = vld [vmem:[#allocation5 + $0x8] sm:$0xff]   ;;  %v427_v4 = vld [vmem:[#allocation5 + $0x10] sm:$0xff]   ;;  %v173_v5 = vld [vmem:[%s663_s1] sm:$0xff]  ;;  %vm126_vm2 = vcmask 1041408   ;;  %vm122_vm3 = vcmask 818176   ;;  %v546_v23 = vmov 1  }
  0x3b   :  { %422 = vset.pattern.permute.xlu0 %v545_v1  ;;  %390 = vmatprep.subr.bf16.mxu1 %v543_v0  ;;  %vm181_vm1 = vcmp.ge.s32.totalorder %v173_v5, 0  ;;  %v176_v6 = vadd.s32 64, %v173_v5  ;;  %v432_v7 = vld [vmem:[#allocation7] sm:$0xff]   ;;  %v433_v10 = vld [vmem:[#allocation7 + $0x8] sm:$0xff]   ;;  %v434_v12 = vld [vmem:[#allocation7 + $0x10] sm:$0xff]   ;;  %vm299_vm4 = vcmp.gt.s32.totalorder %v173_v5, 0 }
  0x3c   :  { %406 = vmatprep.mubr.msk.bf16.mxu1 %vm544_vm0, %v543_v0  ;;  %373 = vmatpush3.bf16.msra.mxu0 %v425_v2  ;;  %v428_v8 = vld [vmem:[#allocation5 + $0x18] sm:$0xff]   ;;  %v182_v9 = vsel %vm181_vm1, 1, %v545_v1  ;;  %v429_v11 = vld [vmem:[#allocation5 + $0x20] sm:$0xff]   ;;  %v430_v13 = vld [vmem:[#allocation5 + $0x28] sm:$0xff]   ;;  %v300_v24 = vsel %vm299_vm4, %v173_v5, 0  ;;  %v80_v27 = vshrl.u32 %v79_v26, 7 }
  0x3d   :  { %374 = vmatprep.subr.bf16.mxu0 %v543_v0  ;;  %178 = vperm.xlu0 %422, %v176_v6   ;;  %v431_v14 = vld [vmem:[#allocation5 + $0x30] ss:$0 sps:$4 sm:$0x33]   ;;  %v64_v16 = vld [vmem:[#allocation2] sm:$0xff]  ;;  %v438_v21 = vld [vmem:[#allocation7 + $0x30] sm:$0xff]   ;;  %vm301_vm5 = vcmp.lt.s32.totalorder %v300_v24, 7 }
  0x3e   :  { %391 = vmatpush3.bf16.msra.mxu1 %v432_v7  ;;  %v435_v15 = vld [vmem:[#allocation7 + $0x18] sm:$0xff]   ;;  %v128_v17 = vsel %vm126_vm2, %v431_v14, 0  ;;  %v436_v18 = vld [vmem:[#allocation7 + $0x20] sm:$0xff]   ;;  %v65_v19 = vpack.c.bf16 %v64_v16, %v64_v16  ;;  %v437_v20 = vld [vmem:[#allocation7 + $0x28] sm:$0xff]   ;;  %423 = vset.pattern.permute.xlu1 %v546_v23  ;;  %v302_v25 = vsel %vm301_vm5, %v300_v24, 7  ;;  %v81_v29 = vsub.s32 0, %v80_v27 }
  0x3f   :  { %392 = vmatprep.subr.bf16.mxu1 %v543_v0  ;;  %v439_v22 = vld [vmem:[#allocation7 + $0x38] sm:$0xff]   ;;  %304 = vperm.xlu1 %423, %v302_v25   ;;  %v63_v30 = vld [vmem:[%s666_s4] sm:$0x3]  ;;  %v175_v31 = vand.u32 127, %v79_v26  ;;  %v209_v44 = vsub.s32 1, %v80_v27  ;;  %vm319_vm14 = vcmask 64512  }
  0x40   :  { %375 = vmatpush3.bf16.msra.mxu0 %v426_v3  ;;  %v82_v33 = vrot.slane %v63_v30, %v81_v29 }
  0x41   :  { %376 = vmatprep.subr.bf16.mxu0 %v543_v0  ;;  %184 = vperm.xlu0 %422, %v182_v9   ;;  %v210_v45 = vrot.slane %v63_v30, %v209_v44  ;;  %vm311_vm11 = vcmp.eq.s32.totalorder %v175_v31, 8  ;;  %vm316_vm12 = vcmp.eq.s32.totalorder %v175_v31, 1  ;;  %vm315_vm13 = vcmp.eq.s32.totalorder %v175_v31, 0 }
  0x42   :  { %393 = vmatpush3.bf16.msra.mxu1 %v433_v10 }
  0x43   :  { %394 = vmatprep.subr.bf16.mxu1 %v543_v0 }
  0x44   :  { %377 = vmatpush3.bf16.msra.mxu0 %v427_v4 }
  0x45   :  { %378 = vmatprep.subr.bf16.mxu0 %v543_v0  ;;  %424 = vset.pattern.permute.xlu0 %v546_v23 }
  0x46   :  { %395 = vmatpush3.bf16.msra.mxu1 %v434_v12 }
  0x47   :  { %396 = vmatprep.subr.bf16.mxu1 %v543_v0 }
  0x48   :  { %379 = vmatpush3.bf16.msra.mxu0 %v428_v8 }
  0x49   :  { %380 = vmatprep.subr.bf16.mxu0 %v543_v0 }
  0x4a   :  { %397 = vmatpush3.bf16.msra.mxu1 %v435_v15 }
  0x4b   :  { %398 = vmatprep.subr.bf16.mxu1 %v543_v0 }
  0x4c   :  { %381 = vmatpush3.bf16.msra.mxu0 %v429_v11 }
  0x4d   :  { %382 = vmatprep.subr.bf16.mxu0 %v543_v0 }
  0x4e   :  { %399 = vmatpush3.bf16.msra.mxu1 %v436_v18 }
  0x4f   :  { %400 = vmatprep.subr.bf16.mxu1 %v543_v0 }
  0x50   :  { %383 = vmatpush3.bf16.msra.mxu0 %v430_v13 }
  0x51   :  { %384 = vmatprep.subr.bf16.mxu0 %v543_v0 }
  0x52   :  { %401 = vmatpush3.bf16.msra.mxu1 %v437_v20 }
  0x53   :  { %402 = vmatprep.subr.bf16.mxu1 %v543_v0 }
  0x54   :  { %385 = vmatpush3.bf16.msra.mxu0 %v128_v17 }
  0x56   :  { %403 = vmatpush3.bf16.msra.mxu1 %v438_v21 }
  0x57   :  { %387 = vmatmul.mubr.msk.bf16.vlgmr.msra.gmra.mrb[0].mxu0 %vm122_vm3, %v65_v19  ;;  %404 = vmatprep.subr.bf16.mxu1 %v543_v0 }
  0x5a   :  { %405 = vmatpush3.bf16.msra.mxu1 %v439_v22 }
  0xbc   :  { %v179_v28 = vpop.permute.xlu0 %178 }
  0xbd   :  { %vm180_vm6 = vcmp.eq.s32.totalorder %v175_v31, %v179_v28 }
  0xbe   :  { %v305_v46 = vpop.permute.xlu1 %304 }
  0xbf   :  { %vm306_vm10 = vcmp.eq.s32.totalorder %v175_v31, %v305_v46 }
  0xc0   :  { %v185_v32 = vpop.permute.xlu0 %184 }
  0xc1   :  { %vm186_vm7 = vcmp.eq.s32.totalorder %v185_v32, 1 }
  0xc2   :  { %vm187_vm8 = vmand %vm180_vm6, %vm186_vm7 }
  0xc3   :  { %v188_v40 = vsel %vm187_vm8, 1.0, %v543_v0 }
 0x12a   :  { %v164_v34 = vpop.f32.mrb[0].mxu0 }
 0x12b   :  { %v165_v35 = vadd.f32 %v164_v34, %v82_v33  ;;  %v388_v36 = vpop.f32.mrb[1].mxu0 }
 0x12c   :  { %v167_v37 = vpop.f32.mrb[2].mxu0 }
 0x12d   :  { %vm170_vm9 = vcmp.gt.f32.partialorder %v165_v35, 0.0  ;;  %v171_v38 = vmul.f32 0.01, %v165_v35  ;;  %v389_v39 = vpop.f32.mrb[3].mxu0 }
 0x12f   :  { %v172_v41 = vsel %vm170_vm9, %v165_v35, %v171_v38 }
 0x130   :  { %v189_v42 = vadd.f32 %v188_v40, %v172_v41 }
 0x132   :  { %v190_v43 = vpack.c.bf16 %v189_v42, %v189_v42 }
 0x134   :  { %407 = vmatmul.mubr.bf16.vlgmr.msra.gmra.mrb[0].mxu1 %v190_v43 }
 0x207   :  { %v293_v47 = vpop.f32.mrb[0].mxu1 }
 0x208   :  { %v294_v48 = vadd.f32 %v293_v47, %v210_v45  ;;  %v408_v49 = vpop.f32.mrb[1].mxu1 }
 0x209   :  { %v296_v50 = vpop.f32.mrb[2].mxu1 }
 0x20a   :  { %v409_v51 = vpop.f32.mrb[3].mxu1  ;;  %v312_v52 = vsel %vm311_vm11, %v294_v48, 0.0  ;;  %v307_v53 = vsel %vm306_vm10, %v294_v48, 0.0 }
 0x20b   :  { %313 = vadd.xlane.f32.xlu0 %v312_v52  ;;  %308 = vadd.xlane.f32.xlu1 %v307_v53 }
 0x298   :  { %v309_v54 = vpop.xlane.xlu1 %308  ;;  %v314_v55 = vpop.xlane.xlu0 %313 }
 0x299   :  { %440 = vtanh.f32 %v309_v54  ;;  %v317_v57 = vsel %vm316_vm12, %v314_v55, 0.0 }
 0x2a3   :  { %v441_v56 = vpop.eup %440 }
 0x2a4   :  { %v318_v58 = vsel %vm315_vm13, %v441_v56, %v317_v57 }
 0x2a5   :  { %320 = vst.msk [vmem:[#allocation8] sm:$0xff] %vm319_vm14, %v318_v58 }
 0x2a6   :  { %325 = vsyncadd [#allocation4], 96  ;;  %s547_s4 = smov [#allocation8]  }
 0x2a7   :  { %s326_s9 = sshll.u32 %s547_s4, 4  ;;  %s327_s9 = int_to_ptr.vmem [resolvable:$true] %s326_s9 }
 0x2a8   :  { %s508_s10 = scalar_lea.vmem %s327_s9, 32  ;;  %s512_s11 = scalar_lea.vmem %s327_s9, 128 }
 0x2a9   :  { %p509_p10 = scmp.ne.s32.totalorder %s327_s9, %s508_s10  ;;  %p513_p11 = scmp.lt.s32.totalorder %s327_s9, %s327_s9 }
 0x2aa   :  { %p514_p12 = scmp.lt.s32.totalorder %s512_s11, %s508_s10 }
 0x2ac   :  { %p515_p13 = por %p514_p12, %p513_p11 }
 0x2ae   :  { %p516_p0 = pnand %p515_p13, %p509_p10 }
 0x2b0   :  { %519 = shalt.err (!%p516_p0)
}
 0x2b1   :  { %s520_s14 = scalar_lea.hbm %s667_s5, 32 }
 0x2b2   :  { %p521_p1 = scmp.ne.s32.totalorder %s667_s5, %s520_s14  ;;  %p524_p2 = scmp.lt.u32.totalorder %s520_s14, %s667_s5 }
 0x2b4   :  { %p526_p3 = pnand %p524_p2, %p521_p1 }
 0x2b6   :  { %529 = shalt.err (!%p526_p3)
}
 0x2b7   :  { %332 = dma.vmem_to_hbm [thread:$0]  %s327_s9, 32, %s667_s5, [#allocation4], %s540_s17, %s540_s17, %s541_s18  }
 0x2b8   :  { %534 = dma.done.wait [#allocation4], 128  }
 0x2b9   :  { %535 = vsyncadd [#allocation4], 4294967168 }
 0x2ba   :  { %336 = vsyncpa [#allocation3], 1 }
 0x2bb   :  { %337 = vsyncpa [#allocation6], 1 }
 0x2bc   :  { %338 = vsyncpa [#allocation4], 1 }

</bundles_post_ra>
